<compile_context>
chip_gen: v7x
topology: tpu7x:2x2x1
jax: 0.10.0
libtpu: 0.0.40
codegen_flags: <defaults>
</compile_context>

<pallas_src>
import functools

import jax
import jax.numpy as jnp
from jax.experimental import pallas as pl
from jax.experimental.pallas import tpu as pltpu


def _transition_kernel(x_ref, ss_ref, w_ref, o_ref):
    # x_ref:  (1, C_in, t_hw)  NCHW-native tile: sublanes = channels, lanes = spatial
    # ss_ref: (2, C_in, 1)     row 0 = BN scale, row 1 = BN shift (f32)
    # w_ref:  (C_out, C_in)    1x1 conv weight (bf16 -> MXU-native)
    # o_ref:  (1, C_out, t_hw) lane-dense output tile
    x = x_ref[0].astype(jnp.float32)                       # (C_in, t_hw)
    h = x * ss_ref[0] + ss_ref[1]                          # folded BatchNorm
    h = jnp.maximum(h, 0.0)                                # act_fn = ReLU
    acc = jnp.dot(w_ref[...], h.astype(w_ref.dtype),       # bf16 x bf16 -> f32 acc
                  preferred_element_type=jnp.float32)      # (C_out, t_hw)
    o_ref[0] = acc.astype(o_ref.dtype)


@functools.partial(jax.jit, static_argnames=("t_hw", "matmul_dtype"))
def transition_layer_last(x_nchw, gamma, beta, conv_w, *, eps=1e-5,
                          t_hw=512, matmul_dtype=jnp.bfloat16):
    """x_nchw: (N, C_in, H, W);  conv_w: (C_out, C_in, 1, 1) as in PyTorch."""
    N, C_in, H, W = x_nchw.shape
    C_out = conv_w.shape[0]
    HW = H * W

    # --- BatchNorm training-mode stats: single fused pass (E[x], E[x^2]). ---
    x_f32 = x_nchw.astype(jnp.float32)  # convert fuses into the reductions
    mean = jnp.mean(x_f32, axis=(0, 2, 3))
    mean_sq = jnp.mean(x_f32 * x_f32, axis=(0, 2, 3))
    var = jnp.maximum(mean_sq - mean * mean, 0.0)          # biased var, clamp cancellation

    scale = gamma.astype(jnp.float32) / jnp.sqrt(var + eps)
    shift = beta.astype(jnp.float32) - mean * scale
    ss = jnp.stack([scale, shift], axis=0).reshape(2, C_in, 1)

    # 1x1 conv weight -> (C_out, C_in) matmul form, bf16 for the MXU.
    w2d = conv_w.reshape(C_out, C_in).astype(matmul_dtype)

    # NCHW kept native: free reshape to (N, C_in, HW); spatial is the lane axis.
    x3d = x_nchw.reshape(N, C_in, HW)

    if HW <= t_hw:
        tile = HW                       # full spatial extent (always a legal block)
        n_hw = 1
    else:
        assert t_hw % 128 == 0, "spatial tile must be a multiple of 128"
        tile = t_hw
        # Ragged last tile is fine: Pallas masks out-of-bounds stores and the
        # computation is independent per spatial lane (no cross-lane mixing).
        n_hw = pl.cdiv(HW, tile)

    grid = (N, n_hw)

    out3d = pl.pallas_call(
        _transition_kernel,
        out_shape=jax.ShapeDtypeStruct((N, C_out, HW), x_nchw.dtype),
        grid_spec=pltpu.PrefetchScalarGridSpec(
            num_scalar_prefetch=0,
            grid=grid,
            in_specs=[
                pl.BlockSpec((1, C_in, tile), lambda n, j: (n, 0, j)),
                pl.BlockSpec((2, C_in, 1), lambda n, j: (0, 0, 0)),
                pl.BlockSpec((C_out, C_in), lambda n, j: (0, 0)),
            ],
            out_specs=pl.BlockSpec((1, C_out, tile), lambda n, j: (n, 0, j)),
        ),
        compiler_params=pltpu.CompilerParams(
            dimension_semantics=("parallel", "parallel"),
            # Above the 16 MiB v5e scoped default so 512-wide tiles pipeline,
            # comfortably below v7x's 64 MiB physical VMEM.
            vmem_limit_bytes=48 * 1024 * 1024,
        ),
    )(x3d, ss, w2d)

    # (N, C_out, HW) -> NCHW, free reshape (no transpose).
    return out3d.reshape(N, C_out, H, W)


def _reference(x_nchw, gamma, beta, conv_w, eps=1e-5, matmul_dtype=jnp.float32):
    """Pure-JAX reference (PyTorch semantics). matmul_dtype quantizes the
    matmul operands the same way the kernel does (bf16 on the MXU)."""
    x = x_nchw.astype(jnp.float32)
    mean = jnp.mean(x, axis=(0, 2, 3), keepdims=True)
    var = jnp.mean(jnp.square(x - mean), axis=(0, 2, 3), keepdims=True)
    h = (x - mean) / jnp.sqrt(var + eps)
    h = h * gamma[None, :, None, None] + beta[None, :, None, None]
    h = jnp.maximum(h, 0.0)
    w2 = conv_w.reshape(conv_w.shape[0], conv_w.shape[1]).astype(jnp.float32)
    h_q = h.astype(matmul_dtype).astype(jnp.float32)
    w_q = w2.astype(matmul_dtype).astype(jnp.float32)
    return jnp.einsum("nchw,oc->nohw", h_q, w_q)


if __name__ == "__main__":
    key = jax.random.PRNGKey(0)
    k_x, k_g, k_b, k_w = jax.random.split(key, 4)

    N, C_IN, H, W = 2, 16, 16, 16
    C_OUT = 8

    x = jax.random.normal(k_x, (N, C_IN, H, W), dtype=jnp.float32)
    gamma = 1.0 + 0.1 * jax.random.normal(k_g, (C_IN,), dtype=jnp.float32)
    beta = 0.1 * jax.random.normal(k_b, (C_IN,), dtype=jnp.float32)
    conv_w = jax.random.normal(k_w, (C_OUT, C_IN, 1, 1), dtype=jnp.float32) * 0.1

    out = transition_layer_last(x, gamma, beta, conv_w)
    out = jax.block_until_ready(out)

    # Compare against a reference whose matmul operands are bf16-quantized the
    # same way as the kernel's MXU path (f32 accumulation in both).
    ref = _reference(x, gamma, beta, conv_w, matmul_dtype=jnp.bfloat16)
    assert out.shape == (N, C_OUT, H, W), out.shape
    max_err = float(jnp.max(jnp.abs(out - ref)))
    assert jnp.allclose(out, ref, atol=2e-2, rtol=2e-2), max_err
    print("KERNEL_OK")
</pallas_src>

<mosaic_0001>
module attributes {stable_mosaic.version = 11 : i64} {
  func.func @_transition_kernel(%arg0: i32, %arg1: i32, %arg2: memref<1x16x256xf32, #tpu.memory_space<vmem>>, %arg3: memref<2x16x1xf32, #tpu.memory_space<vmem>>, %arg4: memref<8x16xbf16, #tpu.memory_space<vmem>>, %arg5: memref<1x8x256xf32, #tpu.memory_space<vmem>>) attributes {dimension_semantics = [#tpu.dimension_semantics<parallel>, #tpu.dimension_semantics<parallel>], iteration_bounds = array<i64: 2, 1>, scalar_prefetch = 0 : i64, scratch_operands = 0 : i64, tpu.core_type = #tpu.core_type<tc>, window_params = [{transform_indices = @transform_0, window_bounds = array<i64: 1, 16, 256>}, {pipeline_mode = #tpu.pipeline_mode<synchronous>, transform_indices = @transform_1, window_bounds = array<i64: 2, 16, 1>}, {pipeline_mode = #tpu.pipeline_mode<synchronous>, transform_indices = @transform_2, window_bounds = array<i64: 8, 16>}, {transform_indices = @transform_3, window_bounds = array<i64: 1, 8, 256>}]} {
    %c0 = arith.constant 0 : index
    %c0_0 = arith.constant 0 : index
    %c0_1 = arith.constant 0 : index
    %0 = vector.load %arg2[%c0, %c0_0, %c0_1] : memref<1x16x256xf32, #tpu.memory_space<vmem>>, vector<1x16x256xf32>
    %1 = vector.shape_cast %0 : vector<1x16x256xf32> to vector<16x256xf32>
    %c0_2 = arith.constant 0 : index
    %c0_3 = arith.constant 0 : index
    %c0_4 = arith.constant 0 : index
    %2 = vector.load %arg3[%c0_2, %c0_3, %c0_4] : memref<2x16x1xf32, #tpu.memory_space<vmem>>, vector<1x16x1xf32>
    %3 = vector.shape_cast %2 : vector<1x16x1xf32> to vector<16x1xf32>
    %4 = vector.broadcast %3 : vector<16x1xf32> to vector<16x256xf32>
    %5 = arith.mulf %1, %4 : vector<16x256xf32>
    %c1 = arith.constant 1 : index
    %c0_5 = arith.constant 0 : index
    %c0_6 = arith.constant 0 : index
    %6 = vector.load %arg3[%c1, %c0_5, %c0_6] : memref<2x16x1xf32, #tpu.memory_space<vmem>>, vector<1x16x1xf32>
    %7 = vector.shape_cast %6 : vector<1x16x1xf32> to vector<16x1xf32>
    %8 = vector.broadcast %7 : vector<16x1xf32> to vector<16x256xf32>
    %9 = arith.addf %5, %8 : vector<16x256xf32>
    %cst = arith.constant 0.000000e+00 : f32
    %10 = vector.broadcast %cst : f32 to vector<16x256xf32>
    %11 = arith.maximumf %9, %10 : vector<16x256xf32>
    %c0_7 = arith.constant 0 : index
    %c0_8 = arith.constant 0 : index
    %12 = vector.load %arg4[%c0_7, %c0_8] : memref<8x16xbf16, #tpu.memory_space<vmem>>, vector<8x16xbf16>
    %13 = arith.truncf %11 : vector<16x256xf32> to vector<16x256xbf16>
    %cst_9 = arith.constant dense<0.000000e+00> : vector<8x256xf32>
    %14 = tpu.matmul %12, %13, %cst_9 {dimension_numbers = #tpu.dot_dimension_numbers<[1], [0], [0], [1], [0, 0, 1, 1], [], []>} : vector<8x16xbf16>, vector<16x256xbf16>, vector<8x256xf32> -> vector<8x256xf32>
    %c0_10 = arith.constant 0 : index
    %c0_11 = arith.constant 0 : index
    %c0_12 = arith.constant 0 : index
    %15 = vector.load %arg5[%c0_10, %c0_11, %c0_12] : memref<1x8x256xf32, #tpu.memory_space<vmem>>, vector<1x8x256xf32>
    %16 = vector.shape_cast %15 : vector<1x8x256xf32> to vector<8x256xf32>
    %17 = vector.shape_cast %14 : vector<8x256xf32> to vector<1x8x256xf32>
    tpu.vector_store %arg5[%c0_10, %c0_11, %c0_12], %17 {strides = array<i32>} : memref<1x8x256xf32, #tpu.memory_space<vmem>>, vector<1x8x256xf32>,
    return
  }
  func.func @transform_0(%arg0: i32, %arg1: i32) -> (i32, i32, i32) {
    %c0_i32 = arith.constant 0 : i32
    %c0_i32_0 = arith.constant 0 : i32
    return %arg0, %c0_i32, %arg1 : i32, i32, i32
  }
  func.func @transform_1(%arg0: i32, %arg1: i32) -> (i32, i32, i32) {
    %c0_i32 = arith.constant 0 : i32
    %c0_i32_0 = arith.constant 0 : i32
    %c0_i32_1 = arith.constant 0 : i32
    %c0_i32_2 = arith.constant 0 : i32
    return %c0_i32, %c0_i32_0, %c0_i32_1 : i32, i32, i32
  }
  func.func @transform_2(%arg0: i32, %arg1: i32) -> (i32, i32) {
    %c0_i32 = arith.constant 0 : i32
    %c0_i32_0 = arith.constant 0 : i32
    %c0_i32_1 = arith.constant 0 : i32
    return %c0_i32, %c0_i32_0 : i32, i32
  }
  func.func @transform_3(%arg0: i32, %arg1: i32) -> (i32, i32, i32) {
    %c0_i32 = arith.constant 0 : i32
    %c0_i32_0 = arith.constant 0 : i32
    return %arg0, %c0_i32, %arg1 : i32, i32, i32
  }
}

</mosaic_0001>

<bundles_post_ra>
// kernel: transition_layer_last.1
= control target key start
LH: loop header
LB: loop body
LE: loop exit
PB: predicated region body
PF: predicated region fallthrough
CT: control target
= control target key end

     0   :  { %s477_s12 = smov 0   ;;  %s479_s13 = smov 0   ;;  %s529_s0 = inlined_call_operand.vmem [shape: f32[2,16,256], index: 0, kind: input, shape index: {}]   ;;  %s530_s1 = inlined_call_operand.vmem [shape: f32[2,16,1], index: 1, kind: input, shape index: {}]   ;;  %s531_s2 = inlined_call_operand.vmem [shape: bf16[8,16], index: 2, kind: input, shape index: {}]   ;;  %s532_s3 = inlined_call_operand.vmem [shape: f32[2,8,256], index: 3, kind: output, shape index: {}]  }
   0x1   :  { %s481_s14 = smov 0  }
   0x2 LB: > { %s25_s15 = sadd.s32 1, %s450_s13  ;;  %p393_p0 = scmp.ge.s32.totalorder %s454_s14, 1  ;;  %s454_s14 = sphi %s481_s14, %s13_s14   ;;  %s450_s13 = sphi %s479_s13, %s534_s13   ;;  %s446_s12 = sphi %s477_s12, %s533_s12  }
   0x3   : > { %p27_p1 = scmp.ge.s32.totalorder %s25_s15, 2  ;;  %p158_p2 = scmp.lt.s32.totalorder %s454_s14, 3 }
   0x5   : > { %s536_s15 = smov (%p27_p1, %s25_s15), 0  ;;  %p159_p3 = pnand %p393_p0, %p158_p2 }
   0x6   : > { %v398_v0 = vld [vmem:[%s530_s1 + $0x10] sm:$0xff] (!%p159_p3)  ;;  %v215_v1 = vld [vmem:[%s530_s1] sm:$0xff] (!%p159_p3)  ;;  %v456_v2 = vmov (!%p159_p3), 0   ;;  %v399_v3 = vld [vmem:[%s530_s1 + $0x18] sm:$0xff] (!%p159_p3)  ;;  %p191_p4 = scmp.lt.s32.totalorder (!%p159_p3), %s446_s12, 1  ;;  %vm255_vm0 = vcmask (!%p159_p3), 130048  }
   0x7   : > { %162 = sbr.rel (%p159_p3) target bundleno = 367 (0x16f), region = 32  ;;  %431 = vset.pattern.permute.xlu1 (!%p159_p3), %v456_v2  ;;  %430 = vset.pattern.permute.xlu0 (!%p159_p3), %v456_v2  ;;  %v216_v4 = vld [vmem:[%s530_s1 + $0x8] sm:$0xff] (!%p159_p3)  ;;  %v252_v27 = vld [vmem:[%s531_s2] sm:$0xf] (!%p159_p3) }
   0x8   : > { %236 = vperm.xlu1 (!%p159_p3), %431, %v398_v0   ;;  %219 = vperm.xlu0 (!%p159_p3), %430, %v215_v1  }
   0x9   : > { %291 = vmatprep.mubr.bf16.mxu0 (!%p159_p3), %v456_v2 }
   0xc   : > { %241 = vperm.xlu1 (!%p159_p3), %431, %v399_v3   ;;  %224 = vperm.xlu0 (!%p159_p3), %430, %v216_v4  }
   0xe   : > { %s538_s12 = smov (!%p191_p4, %s446_s12), 1 }
   0xf   : > { %s403_s24 = sshll.u32 %s538_s12, 5  ;;  %s404_s30 = sshll.u32 %s538_s12, 4 }
  0x10   : > { %s198_s27 = scalar_lea.vmem %s529_s0, %s403_s24  ;;  %s208_s6 = scalar_lea.vmem %s532_s3, %s404_s30 }
  0x11   : > { %v211_v5 = vld [vmem:[%s198_s27] sm:$0xff]  ;;  %v212_v6 = vld [vmem:[%s198_s27 + $0x8] sm:$0xff]  ;;  %v213_v11 = vld [vmem:[%s198_s27 + $0x10] sm:$0xff] }
  0x12   : > { %v214_v12 = vld [vmem:[%s198_s27 + $0x18] sm:$0xff] }
  0x87   : > { %v237_v7 = vpop.permute.xlu1 %236  ;;  %v220_v8 = vpop.permute.xlu0 %219 }
  0x88   : > { %v227_v9 = vmul.f32 %v220_v8, %v211_v5  ;;  %v228_v10 = vmul.f32 %v220_v8, %v212_v6 }
  0x8a   : > { %v244_v14 = vadd.f32 %v237_v7, %v227_v9  ;;  %v245_v17 = vadd.f32 %v237_v7, %v228_v10 }
  0x8b   : > { %v225_v13 = vpop.permute.xlu0 %224  ;;  %v242_v18 = vpop.permute.xlu1 %241 }
  0x8c   : > { %v229_v15 = vmul.f32 %v225_v13, %v213_v11  ;;  %v230_v16 = vmul.f32 %v225_v13, %v214_v12  ;;  %v249_v22 = vmax.f32 %v245_v17, 0.0  ;;  %v248_v24 = vmax.f32 %v244_v14, 0.0 }
  0x8e   : > { %v246_v19 = vadd.f32 %v242_v18, %v229_v15  ;;  %v247_v20 = vadd.f32 %v242_v18, %v230_v16 }
  0x90   : > { %v250_v21 = vmax.f32 %v246_v19, 0.0  ;;  %v251_v23 = vmax.f32 %v247_v20, 0.0 }
  0x92   : > { %v254_v25 = vpack.c.bf16 %v251_v23, %v249_v22  ;;  %v253_v26 = vpack.c.bf16 %v250_v21, %v248_v24 }
  0x94   : > { %259 = vmatprep.subr.bf16.mxu0 %v254_v25 }
  0x95   : > { %260 = vmatpush1.bf16.msra.mxu0 %v253_v26 }
  0x98   : > { %400 = vmatmul.mubr.msk.bf16.vlgmr.msra.gmra.mrb[0].mxu0 %vm255_vm0, %v252_v27 }
 0x16b   : > { %v293_v28 = vpop.f32.mrb[0].mxu0 }
 0x16c   : > { %300 = vst [vmem:[%s208_s6] sm:$0xff] %v293_v28  ;;  %v295_v29 = vpop.f32.mrb[1].mxu0 }
 0x16d   : > { %301 = vst [vmem:[%s208_s6 + $0x8] sm:$0xff] %v295_v29  ;;  %v297_v30 = vpop.f32.mrb[2].mxu0 }
 0x16e   : > { %v298_v31 = vpop.f32.mrb[3].mxu0 }
 0x16f PF: > { %s13_s14 = sadd.s32 1, %s454_s14   ;;  %s533_s12 = smov %s450_s13 }
 0x170   : > { %p10_p5 = scmp.ge.s32.totalorder %s13_s14, 4   ;;  %s534_s13 = smov %s536_s15 }
 0x172   :  { %12 = sbr.rel (!%p10_p5) target bundleno = 2 (0x2), region = 63 }

</bundles_post_ra>
